<compile_context>
chip_gen: v7x
topology: tpu7x:2x2x1
jax: 0.10.0
libtpu: 0.0.40
codegen_flags: <defaults>
</compile_context>

<pallas_src>
import functools

import jax
import jax.numpy as jnp
from jax.experimental import pallas as pl
from jax.experimental.pallas import tpu as pltpu

_LANES = 128
_SUBLANES = 8
_MiB = 1024 * 1024
# Per-tile VMEM byte budget.  1 input + 1 output, double-buffered:
# 4 * 4 MiB = 16 MiB of buffers; we raise vmem_limit_bytes explicitly below so
# this is safe on every generation (incl. v5e's 16 MiB scoped default and
# v7x's 64 MiB physical VMEM) while keeping per-step overhead negligible.
_BLOCK_BYTES = 4 * _MiB


def _swish_kernel(x_ref, o_ref):
    # Compute in the input dtype for f32/bf16.  bf16 exp/reciprocal run on the
    # EUP natively on v6e/v7x (halves transcendental pressure and vreg width);
    # on v5e the compiler widens bf16 elementwise ops internally, so this is
    # at worst neutral there.  Other dtypes are upcast to f32.
    x = x_ref[...]
    if x.dtype not in (jnp.float32, jnp.bfloat16):
        x = x.astype(jnp.float32)
    o_ref[...] = (x * jax.nn.sigmoid(x)).astype(o_ref.dtype)


@functools.lru_cache(maxsize=1)
def _multi_tensorcore():
    """Heuristic chip detection: v7x has 64 MiB VMEM per TensorCore and two
    TensorCores per chip; v5e/v6e have 128 MiB and a single TensorCore."""
    try:
        info = pltpu.get_tpu_info()
        return int(info.vmem_capacity_bytes) <= 64 * _MiB
    except Exception:
        # Fall back to the previously-validated single-core configuration.
        return False


def _swish_slab(x2d, *, block_bytes, multi_core):
    """Run the Swish kernel over a lane-dense (rows, 128) slab."""
    rows = x2d.shape[0]
    itemsize = jnp.dtype(x2d.dtype).itemsize

    # Block rows from the byte budget (doubles automatically for bf16).
    block_rows = max(_SUBLANES, block_bytes // (_LANES * itemsize))
    block_rows = (block_rows // _SUBLANES) * _SUBLANES
    tile_rows = min(block_rows, rows)
    if multi_core and rows > _SUBLANES:
        # Keep >= 2 roughly even grid steps so the core-parallel axis can
        # shard the slab across v7x's two TensorCores.  Gated off on the
        # single-TC v5e/v6e, where it would only shrink the tile and add a
        # pipeline step.
        half = -(-rows // 2)
        half = -(-half // _SUBLANES) * _SUBLANES
        tile_rows = min(tile_rows, half)
    # tile_rows is a multiple of 8 unless it equals the full row count, so the
    # (8, 128) block constraint is always satisfied.
    grid_rows = pl.cdiv(rows, tile_rows)          # ragged last block is masked

    total = rows * _LANES
    cost = pl.CostEstimate(
        flops=3 * total,             # mul + add + mul in x * sigmoid(x)
        transcendentals=2 * total,   # exp + reciprocal inside sigmoid
        bytes_accessed=2 * total * itemsize,
    )

    tile_bytes = tile_rows * _LANES * itemsize
    # Double-buffered input + output, plus headroom for Mosaic scratch.
    # With the default 4 MiB tile this is 24 MiB: above v5e's 16 MiB scoped
    # default (so it must be set), well under every chip's physical VMEM.
    vmem_limit = 4 * tile_bytes + 8 * _MiB

    def build(semantics):
        return pl.pallas_call(
            _swish_kernel,
            out_shape=jax.ShapeDtypeStruct(x2d.shape, x2d.dtype),
            grid_spec=pltpu.PrefetchScalarGridSpec(
                num_scalar_prefetch=0,
                grid=(grid_rows,),
                in_specs=[pl.BlockSpec((tile_rows, _LANES), lambda i: (i, 0))],
                out_specs=pl.BlockSpec((tile_rows, _LANES), lambda i: (i, 0)),
            ),
            compiler_params=pltpu.CompilerParams(
                dimension_semantics=(semantics,),
                vmem_limit_bytes=vmem_limit),
            cost_estimate=cost,
        )

    if multi_core and grid_rows >= 2:
        core_parallel = getattr(pltpu, "CORE_PARALLEL", None)
        if core_parallel is not None:
            try:
                # CORE_PARALLEL is what actually splits the grid axis across
                # v7x's two TensorCores (each with its own ~3.2 TB/s HBM
                # path); plain "parallel" was measured as a near no-op.
                return build(core_parallel)(x2d)
            except Exception:
                pass  # fall back to the portable semantics below
    return build("parallel")(x2d)


def q_swish(x, *, act_func=True, num_bit=32, block_bytes=_BLOCK_BYTES):
    """Pallas implementation of Q_Swish.forward (default num_bit=32 path)."""
    if num_bit < 32:
        # TODO(synk): LearnedTwosidedClippedLinearQuantization (num_bit < 32)
        # is not exercised by the default module init and is not implemented.
        raise NotImplementedError(
            "Q_Swish with num_bit < 32 (learned clipped quantization) is not "
            "implemented in the Pallas kernel.")
    if not act_func:
        return x  # forward is identity when act_func=False and num_bit==32

    total = x.size
    if total == 0:
        return x

    orig_shape = x.shape
    orig_dtype = x.dtype
    x_flat = x.reshape(-1)                       # zero-copy (row-major bitcast)
    multi_core = _multi_tensorcore()

    rem = total % _LANES
    aligned = total - rem

    if rem == 0:
        # Fast path: pure zero-copy reshape to a lane-dense (rows, 128) slab.
        out2d = _swish_slab(x_flat.reshape(total // _LANES, _LANES),
                            block_bytes=block_bytes, multi_core=multi_core)
        return out2d.reshape(orig_shape)

    # Ragged path: kernel on the 128-aligned prefix, <=127-element tail in
    # plain jnp, stitched at the end.  This replaces the whole-tensor jnp.pad
    # + out[:total] slice (two full extra HBM passes) with a contiguous prefix
    # slice and a tiny tail computation.
    # TODO(synk): a fully in-kernel ragged tail (masked final 1-D block) would
    # also remove the remaining stitch pass.
    parts = []
    if aligned:
        prefix2d = x_flat[:aligned].reshape(aligned // _LANES, _LANES)
        out_prefix = _swish_slab(prefix2d, block_bytes=block_bytes,
                                 multi_core=multi_core)
        parts.append(out_prefix.reshape(-1))
    tail = x_flat[aligned:].astype(jnp.float32)
    parts.append((tail * jax.nn.sigmoid(tail)).astype(orig_dtype))
    out_flat = parts[0] if len(parts) == 1 else jnp.concatenate(parts)
    return out_flat.reshape(orig_shape)


if __name__ == "__main__":
    key = jax.random.PRNGKey(0)

    # NCHW, matching PyTorch conv-style activations: batch=2, C=4, H=W=16
    x = jax.random.normal(key, (2, 4, 16, 16), dtype=jnp.float32)
    out = jax.block_until_ready(q_swish(x))
    ref = x * jax.nn.sigmoid(x)
    assert out.shape == x.shape and out.dtype == x.dtype
    assert float(jnp.max(jnp.abs(out - ref))) < 1e-5

    # Shape whose size is NOT a multiple of 128 -> prefix + jnp tail path.
    x2 = jax.random.normal(key, (3, 5, 7, 11), dtype=jnp.float32)
    out2 = jax.block_until_ready(q_swish(x2))
    ref2 = x2 * jax.nn.sigmoid(x2)
    assert out2.shape == x2.shape and out2.dtype == x2.dtype
    assert float(jnp.max(jnp.abs(out2 - ref2))) < 1e-5

    # bf16 path (native bf16 compute inside the kernel on v6e/v7x).
    x3 = jax.random.normal(key, (2, 8, 8, 32), dtype=jnp.bfloat16)
    out3 = jax.block_until_ready(q_swish(x3))
    x3f = x3.astype(jnp.float32)
    ref3 = (x3f * jax.nn.sigmoid(x3f)).astype(jnp.bfloat16).astype(jnp.float32)
    assert out3.shape == x3.shape and out3.dtype == x3.dtype
    assert float(jnp.max(jnp.abs(out3.astype(jnp.float32) - ref3))) < 0.1

    # identity path (act_func=False, num_bit=32)
    assert jax.block_until_ready(q_swish(x, act_func=False)) is x

    print("KERNEL_OK")
</pallas_src>

<mosaic_0001>
module attributes {stable_mosaic.version = 11 : i64} {
  func.func @_swish_kernel(%arg0: i32, %arg1: memref<16x128xf32, #tpu.memory_space<vmem>>, %arg2: memref<16x128xf32, #tpu.memory_space<vmem>>) attributes {dimension_semantics = [#tpu.dimension_semantics<parallel>], iteration_bounds = array<i64: 1>, scalar_prefetch = 0 : i64, scratch_operands = 0 : i64, tpu.core_type = #tpu.core_type<tc>, window_params = [{transform_indices = @transform_0, window_bounds = array<i64: 16, 128>}, {transform_indices = @transform_1, window_bounds = array<i64: 16, 128>}]} {
    %c0 = arith.constant 0 : index
    %c0_0 = arith.constant 0 : index
    %0 = vector.load %arg1[%c0, %c0_0] : memref<16x128xf32, #tpu.memory_space<vmem>>, vector<16x128xf32>
    %1 = arith.negf %0 : vector<16x128xf32>
    %2 = math.exp %1 : vector<16x128xf32>
    %cst = arith.constant 1.000000e+00 : f32
    %3 = vector.broadcast %cst : f32 to vector<16x128xf32>
    %4 = arith.addf %3, %2 : vector<16x128xf32>
    %5 = arith.divf %3, %4 : vector<16x128xf32>
    %6 = arith.mulf %0, %5 : vector<16x128xf32>
    %c0_1 = arith.constant 0 : index
    %c0_2 = arith.constant 0 : index
    %7 = vector.load %arg2[%c0_1, %c0_2] : memref<16x128xf32, #tpu.memory_space<vmem>>, vector<16x128xf32>
    tpu.vector_store %arg2[%c0_1, %c0_2], %6 {strides = array<i32>} : memref<16x128xf32, #tpu.memory_space<vmem>>, vector<16x128xf32>,
    return
  }
  func.func @transform_0(%arg0: i32) -> (i32, i32) {
    %c0_i32 = arith.constant 0 : i32
    %c0_i32_0 = arith.constant 0 : i32
    return %arg0, %c0_i32 : i32, i32
  }
  func.func @transform_1(%arg0: i32) -> (i32, i32) {
    %c0_i32 = arith.constant 0 : i32
    %c0_i32_0 = arith.constant 0 : i32
    return %arg0, %c0_i32 : i32, i32
  }
}

</mosaic_0001>

<bundles_post_ra>
// kernel: tpu_custom_call.1
= control target key start
LH: loop header
LB: loop body
LE: loop exit
PB: predicated region body
PF: predicated region fallthrough
CT: control target
= control target key end

     0   :  { %6 = vsyncpa [#allocation3], 0  ;;  %s164_s0 = inlined_call_operand.hbm [shape: f32[16,128], index: 0, kind: input, shape index: {}]   ;;  %s165_s1 = inlined_call_operand.hbm [shape: f32[16,128], index: 1, kind: output, shape index: {}]  }
   0x1   :  { %7 = vsyncpa [#allocation4], 0  ;;  %s120_s6 = smov [#allocation2]   ;;  %s72_s10 = scalar_lea.hbm %s164_s0, 256 }
   0x2   :  { %s13_s7 = sshll.u32 %s120_s6, 4  ;;  %p73_p0 = scmp.ne.s32.totalorder %s164_s0, %s72_s10  ;;  %s14_s7 = int_to_ptr.vmem [resolvable:$true] %s13_s7 }
   0x3   :  { %p76_p1 = scmp.lt.u32.totalorder %s72_s10, %s164_s0 }
   0x5   :  { %p78_p2 = pnand %p76_p1, %p73_p0 }
   0x7   :  { %81 = shalt.err (!%p78_p2)
}
   0x8   :  { %s82_s15 = scalar_lea.vmem %s14_s7, 256  ;;  %p87_p4 = scmp.lt.s32.totalorder %s14_s7, %s14_s7 }
   0x9   :  { %p83_p3 = scmp.ne.s32.totalorder %s14_s7, %s82_s15  ;;  %p88_p5 = scmp.lt.s32.totalorder %s82_s15, %s82_s15 }
   0xb   :  { %p89_p6 = por %p88_p5, %p87_p4 }
   0xd   :  { %p90_p7 = pnand %p89_p6, %p83_p3 }
   0xf   :  { %93 = shalt.err (!%p90_p7)
}
  0x10   :  { %s121_s16 = smov 128   ;;  %s122_s17 = smov 8  }
  0x11   :  { %19 = dma.hbm_to_vmem [thread:$0]  %s164_s0, 256, %s14_s7, [#allocation3], %s121_s16, %s121_s16, %s122_s17  }
  0x12   :  { %116 = dma.done.wait [#allocation3], 256  }
  0x13   :  { %117 = vsyncadd [#allocation3], 4294967040  ;;  %v23_v0 = vld [vmem:[#allocation2] sm:$0xff]  ;;  %v24_v1 = vld [vmem:[#allocation2 + $0x8] sm:$0xff]  ;;  %s123_s20 = smov [#allocation5]  }
  0x14   :  { %v58_v2 = vmul.f32 -1.442695, %v23_v0  ;;  %v59_v3 = vmul.f32 -1.442695, %v24_v1  ;;  %s46_s21 = sshll.u32 %s123_s20, 4  ;;  %s47_s21 = int_to_ptr.vmem [resolvable:$true] %s46_s21 }
  0x15   :  { %s94_s0 = scalar_lea.vmem %s47_s21, 256  ;;  %p99_p9 = scmp.lt.s32.totalorder %s47_s21, %s47_s21 }
  0x16   :  { %64 = vpow2.f32 %v58_v2  ;;  %p95_p8 = scmp.ne.s32.totalorder %s47_s21, %s94_s0  ;;  %p100_p10 = scmp.lt.s32.totalorder %s94_s0, %s94_s0 }
  0x17   :  { %66 = vpow2.f32 %v59_v3 }
  0x18   :  { %p101_p11 = por %p100_p10, %p99_p9 }
  0x1a   :  { %p102_p12 = pnand %p101_p11, %p95_p8 }
  0x20   :  { %v65_v4 = vpop.eup %64 }
  0x21   :  { %v67_v5 = vpop.eup %66  ;;  %v31_v6 = vadd.f32 1.0, %v65_v4 }
  0x22   :  { %v32_v7 = vadd.f32 1.0, %v67_v5 }
  0x23   :  { %68 = vrcp.f32 %v31_v6 }
  0x24   :  { %70 = vrcp.f32 %v32_v7 }
  0x2d   :  { %v69_v8 = vpop.eup %68 }
  0x2e   :  { %v71_v9 = vpop.eup %70  ;;  %v37_v10 = vmul.f32 %v69_v8, %v23_v0 }
  0x2f   :  { %v38_v11 = vmul.f32 %v71_v9, %v24_v1 }
  0x30   :  { %39 = vst [vmem:[#allocation5] sm:$0xff] %v37_v10 }
  0x31   :  { %40 = vst [vmem:[#allocation5 + $0x8] sm:$0xff] %v38_v11 }
  0x32   :  { %105 = shalt.err (!%p102_p12)
}
  0x33   :  { %s106_s24 = scalar_lea.hbm %s165_s1, 256 }
  0x34   :  { %p107_p13 = scmp.ne.s32.totalorder %s165_s1, %s106_s24  ;;  %p110_p0 = scmp.lt.u32.totalorder %s106_s24, %s165_s1 }
  0x36   :  { %p112_p1 = pnand %p110_p0, %p107_p13 }
  0x38   :  { %115 = shalt.err (!%p112_p1)
}
  0x39   :  { %52 = dma.vmem_to_hbm [thread:$0]  %s47_s21, 256, %s165_s1, [#allocation4], %s121_s16, %s121_s16, %s122_s17  }
  0x3a   :  { %118 = dma.done.wait [#allocation4], 256  }
  0x3b   :  { %119 = vsyncadd [#allocation4], 4294967040 }
  0x3c   :  { %56 = vsyncpa [#allocation3], 1 }
  0x3d   :  { %57 = vsyncpa [#allocation4], 1 }

</bundles_post_ra>
